<compile_context>
chip_gen: v7x
topology: tpu7x:2x2x1
jax: 0.10.0
libtpu: 0.0.40
codegen_flags: <defaults>
</compile_context>

<pallas_src>
import jax
import jax.numpy as jnp
from jax.experimental import pallas as pl
from jax.experimental.pallas import tpu as pltpu

OUT_SCALE = 0.001
CPAD = 8   # conv-1 input channels padded to 8 -> sublane-aligned im2col row blocks


# ----------------------------------------------------------------------------
# Fused forward: backbone(z), backbone(x), SiamFC head -- one pallas_call
# ----------------------------------------------------------------------------
def net_forward(z, x, params, *, batch_per_step=1):
    w1, b1, w2, b2 = params["w1"], params["b1"], params["w2"], params["b2"]
    B, CIN, HZ, WZ = z.shape
    _, _, HX, WX = x.shape
    C1, _, KH, KW = w1.shape
    C2 = w2.shape[0]
    G = int(batch_per_step)
    assert B % G == 0 and CIN <= CPAD and WZ <= WX and HZ <= HX

    # spatial dims after each VALID conv
    HZ1, WZ1 = HZ - KH + 1, WZ - KW + 1
    HZ2, WZ2 = HZ1 - KH + 1, WZ1 - KW + 1
    HX1, WX1 = HX - KH + 1, WX - KW + 1
    HX2, WX2 = HX1 - KH + 1, WX1 - KW + 1
    HO, WO = HX2 - HZ2 + 1, WX2 - WZ2 + 1        # head output spatial (9, 9)
    NT = HZ2 * WZ2                               # template taps in the head (16)

    # Lane layout: row stride = WX everywhere.  Per batch element the channel row is
    #   [ z padded to HZ x WX (128 lanes) | x HX x WX (256 lanes) ] -> SEG lanes,
    # and G elements are lane-concatenated per grid step.
    SEG = HZ * WX + HX * WX                      # 384
    M0 = G * SEG                                 # input lane width / channel / step
    SH = (KH - 1) * WX + (KW - 1)                # largest im2col shift (34)
    M1 = M0 - SH                                 # conv1 output width (covers all needed cols)
    M2 = M1 - SH                                 # conv2 output width
    MH = (HO - 1) * WX + WO                      # strided head-response width (137)
    MHX = (HX2 - 1) * WX + WX2                   # xf width the head reads (188)
    OW = 256                                     # lane-dense per-element output width
    NSTEP = B // G
    KC1, KC2 = KH * KW * CPAD, KH * KW * C1      # packed contraction depths (72, 72)
    assert OW >= MH
    assert (G - 1) * SEG + HZ * WX + MHX <= M2   # last element's head reads stay in bounds

    # ---------------- host-side packing (tiny, fused under jit) ----------------
    zp = jnp.pad(z, ((0, 0), (0, CPAD - CIN), (0, 0), (0, WX - WZ)))   # zero pad rows/chans
    xp = jnp.pad(x, ((0, 0), (0, CPAD - CIN), (0, 0), (0, 0)))
    seg = jnp.concatenate([zp.reshape(B, CPAD, HZ * WX),
                           xp.reshape(B, CPAD, HX * WX)], axis=2)      # (B, 8, SEG)
    inp = (seg.reshape(NSTEP, G, CPAD, SEG)
              .transpose(0, 2, 1, 3)
              .reshape(NSTEP, CPAD, M0)
              .astype(jnp.bfloat16))

    # weights regrouped so im2col row (tap*C + c) matches weight column (tap*C + c)
    w1_p = jnp.pad(w1, ((0, 0), (0, CPAD - CIN), (0, 0), (0, 0)))
    w1_p = jnp.transpose(w1_p, (0, 2, 3, 1)).reshape(C1, KC1).astype(jnp.bfloat16)
    w2_p = jnp.transpose(w2, (0, 2, 3, 1)).reshape(C2, KC2).astype(jnp.bfloat16)
    b1_p = b1.reshape(C1, 1).astype(jnp.float32)
    b2_p = b2.reshape(C2, 1).astype(jnp.float32)

    taps = [(di, dj) for di in range(KH) for dj in range(KW)]

    def kernel(in_ref, w1_ref, b1_ref, w2_ref, b2_ref, o_ref,
               c1_scr, a1_scr, c2_scr, feat_scr, zg_scr, rf_scr):
        o_ref[...] = jnp.zeros_like(o_ref)

        # ---- conv1: materialize the 9 shifted views once, then ONE K=72 matmul ----
        for t, (di, dj) in enumerate(taps):
            off = di * WX + dj
            c1_scr[t * CPAD:(t + 1) * CPAD, :] = in_ref[0, :, off:off + M1]
        a1 = jnp.dot(w1_ref[...], c1_scr[...], preferred_element_type=jnp.float32)
        a1_scr[...] = jnp.maximum(a1 + b1_ref[...], 0.0).astype(jnp.bfloat16)

        # ---- conv2: same im2col-once + one K=72 matmul --------------------------
        for t, (di, dj) in enumerate(taps):
            off = di * WX + dj
            c2_scr[t * C1:(t + 1) * C1, :] = a1_scr[:, off:off + M2]
        a2 = jnp.dot(w2_ref[...], c2_scr[...], preferred_element_type=jnp.float32)
        feat_scr[...] = jnp.maximum(a2 + b2_ref[...], 0.0)

        # ---- SiamFC head on the MXU ---------------------------------------------
        for g in range(G):
            zoff = g * SEG
            xoff = zoff + HZ * WX
            # gather the template taps into (C2, NT): one contiguous strip per z row
            for i in range(HZ2):
                zg_scr[:, i * WZ2:(i + 1) * WZ2] = \
                    feat_scr[:, zoff + i * WX: zoff + i * WX + WZ2]
            # (NT, C2) @ (C2, MHX): per-tap channel correlations for every x position
            rf_scr[...] = jnp.dot(zg_scr[...].T,
                                  feat_scr[:, xoff:xoff + MHX],
                                  preferred_element_type=jnp.float32)
            # accumulate the 16 shifted tap rows into the strided response row
            resp = rf_scr[0:1, 0:MH]
            for t in range(1, NT):
                i, j = divmod(t, WZ2)
                off = i * WX + j
                resp = resp + rf_scr[t:t + 1, off:off + MH]
            o_ref[0, :, g * OW:g * OW + MH] = OUT_SCALE * resp

    out = pl.pallas_call(
        kernel,
        out_shape=jax.ShapeDtypeStruct((NSTEP, 1, G * OW), jnp.float32),
        grid=(NSTEP,),
        in_specs=[
            pl.BlockSpec((1, CPAD, M0), lambda s: (s, 0, 0)),
            pl.BlockSpec((C1, KC1), lambda s: (0, 0)),
            pl.BlockSpec((C1, 1), lambda s: (0, 0)),
            pl.BlockSpec((C2, KC2), lambda s: (0, 0)),
            pl.BlockSpec((C2, 1), lambda s: (0, 0)),
        ],
        out_specs=pl.BlockSpec((1, 1, G * OW), lambda s: (s, 0, 0)),
        scratch_shapes=[
            pltpu.VMEM((KC1, M1), jnp.bfloat16),   # conv1 im2col
            pltpu.VMEM((C1, M1), jnp.bfloat16),    # conv1 activation
            pltpu.VMEM((KC2, M2), jnp.bfloat16),   # conv2 im2col
            pltpu.VMEM((C2, M2), jnp.float32),     # conv2 features (zf | xf lane-concat)
            pltpu.VMEM((C2, NT), jnp.float32),     # gathered z template taps
            pltpu.VMEM((NT, MHX), jnp.float32),    # head per-tap correlations
        ],
        compiler_params=pltpu.CompilerParams(
            dimension_semantics=("parallel",),     # v7x: 2 TCs split the batch steps
        ),
    )(inp, w1_p, b1_p, w2_p, b2_p)

    # strip the row-stride junk: valid response entry (ho, wo) sits at lane ho*WX + wo.
    resp = out[:, 0, :].reshape(B, OW)[:, :MH]                # (B, 137)
    resp = jnp.pad(resp, ((0, 0), (0, HO * WX - MH)))         # (B, HO*WX)
    resp = resp.reshape(B, HO, WX)[:, :, :WO]                 # (B, HO, WO)
    return resp[:, None, :, :]                                # (B, 1, HO, WO)


# ----------------------------------------------------------------------------
# Pure-JAX reference for verification (gold standard, HIGHEST precision)
# ----------------------------------------------------------------------------
def _ref_forward(z, x, params):
    prec = jax.lax.Precision.HIGHEST

    def conv(inp, w, b):
        out = jax.lax.conv_general_dilated(
            inp, w, (1, 1), "VALID",
            dimension_numbers=("NCHW", "OIHW", "NCHW"), precision=prec)
        return jnp.maximum(out + b[None, :, None, None], 0.0)

    def bb(inp):
        return conv(conv(inp, params["w1"], params["b1"]),
                    params["w2"], params["b2"])

    zf, xf = bb(z), bb(x)
    outs = []
    for bi in range(zf.shape[0]):
        o = jax.lax.conv_general_dilated(
            xf[bi:bi + 1], zf[bi:bi + 1], (1, 1), "VALID",
            dimension_numbers=("NCHW", "OIHW", "NCHW"), precision=prec)
        outs.append(o)
    return OUT_SCALE * jnp.concatenate(outs, axis=0)


if __name__ == "__main__":
    key = jax.random.PRNGKey(0)
    kz, kx, k1, k2, k3, k4 = jax.random.split(key, 6)
    z = jax.random.normal(kz, (2, 3, 8, 8), jnp.float32)      # exemplar
    x = jax.random.normal(kx, (2, 3, 16, 16), jnp.float32)    # search region
    params = {
        "w1": 0.1 * jax.random.normal(k1, (8, 3, 3, 3), jnp.float32),
        "b1": 0.1 * jax.random.normal(k2, (8,), jnp.float32),
        "w2": 0.1 * jax.random.normal(k3, (16, 8, 3, 3), jnp.float32),
        "b2": 0.1 * jax.random.normal(k4, (16,), jnp.float32),
    }

    ref = _ref_forward(z, x, params)
    scale = float(jnp.max(jnp.abs(ref))) + 1e-12

    fwd = jax.jit(net_forward, static_argnames=("batch_per_step",))
    # batch_per_step=1: one element per grid step (v7x: the two TCs split the batch).
    # batch_per_step=2: batch folded into a single wide grid step (v5e/v6e: one TC,
    #                   amortizes the ~0.35us per-grid-step overhead, doubles matmul M).
    for g in (1, 2):
        out = jax.block_until_ready(fwd(z, x, params, batch_per_step=g))
        assert out.shape == (2, 1, 9, 9), out.shape
        err = float(jnp.max(jnp.abs(out - ref)))
        # bf16 conv operands + default MXU precision in the head give bf16-class
        # rounding vs. the f32-HIGHEST reference; real bugs show up as O(1) errors.
        assert err <= 4e-2 * scale + 1e-6, f"mismatch (group={g}): max_err={err}, ref_scale={scale}"

    print("KERNEL_OK")
</pallas_src>

<mosaic_0001>
module attributes {stable_mosaic.version = 11 : i64} {
  func.func @kernel(%arg0: i32, %arg1: memref<1x8x384xbf16, #tpu.memory_space<vmem>>, %arg2: memref<8x72xbf16, #tpu.memory_space<vmem>>, %arg3: memref<8x1xf32, #tpu.memory_space<vmem>>, %arg4: memref<16x72xbf16, #tpu.memory_space<vmem>>, %arg5: memref<16x1xf32, #tpu.memory_space<vmem>>, %arg6: memref<1x1x256xf32, #tpu.memory_space<vmem>>, %arg7: memref<72x350xbf16, #tpu.memory_space<vmem>>, %arg8: memref<8x350xbf16, #tpu.memory_space<vmem>>, %arg9: memref<72x316xbf16, #tpu.memory_space<vmem>>, %arg10: memref<16x316xf32, #tpu.memory_space<vmem>>, %arg11: memref<16x16xf32, #tpu.memory_space<vmem>>, %arg12: memref<16x188xf32, #tpu.memory_space<vmem>>) attributes {dimension_semantics = [#tpu.dimension_semantics<parallel>], iteration_bounds = array<i64: 2>, scalar_prefetch = 0 : i64, scratch_operands = 6 : i64, tpu.core_type = #tpu.core_type<tc>, window_params = [{transform_indices = @transform_0, window_bounds = array<i64: 1, 8, 384>}, {pipeline_mode = #tpu.pipeline_mode<synchronous>, transform_indices = @transform_1, window_bounds = array<i64: 8, 72>}, {pipeline_mode = #tpu.pipeline_mode<synchronous>, transform_indices = @transform_2, window_bounds = array<i64: 8, 1>}, {pipeline_mode = #tpu.pipeline_mode<synchronous>, transform_indices = @transform_3, window_bounds = array<i64: 16, 72>}, {pipeline_mode = #tpu.pipeline_mode<synchronous>, transform_indices = @transform_4, window_bounds = array<i64: 16, 1>}, {transform_indices = @transform_5, window_bounds = array<i64: 1, 1, 256>}]} {
    %cst = arith.constant 0.000000e+00 : f32
    %0 = vector.broadcast %cst : f32 to vector<1x1x256xf32>
    %c0 = arith.constant 0 : index
    %c0_0 = arith.constant 0 : index
    %c0_1 = arith.constant 0 : index
    %1 = vector.load %arg6[%c0, %c0_0, %c0_1] : memref<1x1x256xf32, #tpu.memory_space<vmem>>, vector<1x1x256xf32>
    tpu.vector_store %arg6[%c0, %c0_0, %c0_1], %0 {strides = array<i32>} : memref<1x1x256xf32, #tpu.memory_space<vmem>>, vector<1x1x256xf32>,
    %c0_2 = arith.constant 0 : index
    %c0_3 = arith.constant 0 : index
    %c0_4 = arith.constant 0 : index
    %2 = vector.load %arg1[%c0_2, %c0_3, %c0_4] : memref<1x8x384xbf16, #tpu.memory_space<vmem>>, vector<1x8x350xbf16>
    %3 = vector.shape_cast %2 : vector<1x8x350xbf16> to vector<8x350xbf16>
    %c0_5 = arith.constant 0 : index
    %c0_6 = arith.constant 0 : index
    %4 = vector.load %arg7[%c0_5, %c0_6] : memref<72x350xbf16, #tpu.memory_space<vmem>>, vector<8x350xbf16>
    tpu.vector_store %arg7[%c0_5, %c0_6], %3 {strides = array<i32>} : memref<72x350xbf16, #tpu.memory_space<vmem>>, vector<8x350xbf16>,
    %c0_7 = arith.constant 0 : index
    %c0_8 = arith.constant 0 : index
    %c1 = arith.constant 1 : index
    %5 = vector.load %arg1[%c0_7, %c0_8, %c1] : memref<1x8x384xbf16, #tpu.memory_space<vmem>>, vector<1x8x350xbf16>
    %6 = vector.shape_cast %5 : vector<1x8x350xbf16> to vector<8x350xbf16>
    %c8 = arith.constant 8 : index
    %c0_9 = arith.constant 0 : index
    %7 = vector.load %arg7[%c8, %c0_9] : memref<72x350xbf16, #tpu.memory_space<vmem>>, vector<8x350xbf16>
    tpu.vector_store %arg7[%c8, %c0_9], %6 {strides = array<i32>} : memref<72x350xbf16, #tpu.memory_space<vmem>>, vector<8x350xbf16>,
    %c0_10 = arith.constant 0 : index
    %c0_11 = arith.constant 0 : index
    %c2 = arith.constant 2 : index
    %8 = vector.load %arg1[%c0_10, %c0_11, %c2] : memref<1x8x384xbf16, #tpu.memory_space<vmem>>, vector<1x8x350xbf16>
    %9 = vector.shape_cast %8 : vector<1x8x350xbf16> to vector<8x350xbf16>
    %c16 = arith.constant 16 : index
    %c0_12 = arith.constant 0 : index
    %10 = vector.load %arg7[%c16, %c0_12] : memref<72x350xbf16, #tpu.memory_space<vmem>>, vector<8x350xbf16>
    tpu.vector_store %arg7[%c16, %c0_12], %9 {strides = array<i32>} : memref<72x350xbf16, #tpu.memory_space<vmem>>, vector<8x350xbf16>,
    %c0_13 = arith.constant 0 : index
    %c0_14 = arith.constant 0 : index
    %c16_15 = arith.constant 16 : index
    %11 = vector.load %arg1[%c0_13, %c0_14, %c16_15] : memref<1x8x384xbf16, #tpu.memory_space<vmem>>, vector<1x8x350xbf16>
    %12 = vector.shape_cast %11 : vector<1x8x350xbf16> to vector<8x350xbf16>
    %c24 = arith.constant 24 : index
    %c0_16 = arith.constant 0 : index
    %13 = vector.load %arg7[%c24, %c0_16] : memref<72x350xbf16, #tpu.memory_space<vmem>>, vector<8x350xbf16>
    tpu.vector_store %arg7[%c24, %c0_16], %12 {strides = array<i32>} : memref<72x350xbf16, #tpu.memory_space<vmem>>, vector<8x350xbf16>,
    %c0_17 = arith.constant 0 : index
    %c0_18 = arith.constant 0 : index
    %c17 = arith.constant 17 : index
    %14 = vector.load %arg1[%c0_17, %c0_18, %c17] : memref<1x8x384xbf16, #tpu.memory_space<vmem>>, vector<1x8x350xbf16>
    %15 = vector.shape_cast %14 : vector<1x8x350xbf16> to vector<8x350xbf16>
    %c32 = arith.constant 32 : index
    %c0_19 = arith.constant 0 : index
    %16 = vector.load %arg7[%c32, %c0_19] : memref<72x350xbf16, #tpu.memory_space<vmem>>, vector<8x350xbf16>
    tpu.vector_store %arg7[%c32, %c0_19], %15 {strides = array<i32>} : memref<72x350xbf16, #tpu.memory_space<vmem>>, vector<8x350xbf16>,
    %c0_20 = arith.constant 0 : index
    %c0_21 = arith.constant 0 : index
    %c18 = arith.constant 18 : index
    %17 = vector.load %arg1[%c0_20, %c0_21, %c18] : memref<1x8x384xbf16, #tpu.memory_space<vmem>>, vector<1x8x350xbf16>
    %18 = vector.shape_cast %17 : vector<1x8x350xbf16> to vector<8x350xbf16>
    %c40 = arith.constant 40 : index
    %c0_22 = arith.constant 0 : index
    %19 = vector.load %arg7[%c40, %c0_22] : memref<72x350xbf16, #tpu.memory_space<vmem>>, vector<8x350xbf16>
    tpu.vector_store %arg7[%c40, %c0_22], %18 {strides = array<i32>} : memref<72x350xbf16, #tpu.memory_space<vmem>>, vector<8x350xbf16>,
    %c0_23 = arith.constant 0 : index
    %c0_24 = arith.constant 0 : index
    %c32_25 = arith.constant 32 : index
    %20 = vector.load %arg1[%c0_23, %c0_24, %c32_25] : memref<1x8x384xbf16, #tpu.memory_space<vmem>>, vector<1x8x350xbf16>
    %21 = vector.shape_cast %20 : vector<1x8x350xbf16> to vector<8x350xbf16>
    %c48 = arith.constant 48 : index
    %c0_26 = arith.constant 0 : index
    %22 = vector.load %arg7[%c48, %c0_26] : memref<72x350xbf16, #tpu.memory_space<vmem>>, vector<8x350xbf16>
    tpu.vector_store %arg7[%c48, %c0_26], %21 {strides = array<i32>} : memref<72x350xbf16, #tpu.memory_space<vmem>>, vector<8x350xbf16>,
    %c0_27 = arith.constant 0 : index
    %c0_28 = arith.constant 0 : index
    %c33 = arith.constant 33 : index
    %23 = vector.load %arg1[%c0_27, %c0_28, %c33] : memref<1x8x384xbf16, #tpu.memory_space<vmem>>, vector<1x8x350xbf16>
    %24 = vector.shape_cast %23 : vector<1x8x350xbf16> to vector<8x350xbf16>
    %c56 = arith.constant 56 : index
    %c0_29 = arith.constant 0 : index
    %25 = vector.load %arg7[%c56, %c0_29] : memref<72x350xbf16, #tpu.memory_space<vmem>>, vector<8x350xbf16>
    tpu.vector_store %arg7[%c56, %c0_29], %24 {strides = array<i32>} : memref<72x350xbf16, #tpu.memory_space<vmem>>, vector<8x350xbf16>,
    %c0_30 = arith.constant 0 : index
    %c0_31 = arith.constant 0 : index
    %c34 = arith.constant 34 : index
    %26 = vector.load %arg1[%c0_30, %c0_31, %c34] : memref<1x8x384xbf16, #tpu.memory_space<vmem>>, vector<1x8x350xbf16>
    %27 = vector.shape_cast %26 : vector<1x8x350xbf16> to vector<8x350xbf16>
    %c64 = arith.constant 64 : index
    %c0_32 = arith.constant 0 : index
    %28 = vector.load %arg7[%c64, %c0_32] : memref<72x350xbf16, #tpu.memory_space<vmem>>, vector<8x350xbf16>
    tpu.vector_store %arg7[%c64, %c0_32], %27 {strides = array<i32>} : memref<72x350xbf16, #tpu.memory_space<vmem>>, vector<8x350xbf16>,
    %c0_33 = arith.constant 0 : index
    %c0_34 = arith.constant 0 : index
    %29 = vector.load %arg2[%c0_33, %c0_34] : memref<8x72xbf16, #tpu.memory_space<vmem>>, vector<8x72xbf16>
    %c0_35 = arith.constant 0 : index
    %c0_36 = arith.constant 0 : index
    %30 = vector.load %arg7[%c0_35, %c0_36] : memref<72x350xbf16, #tpu.memory_space<vmem>>, vector<72x350xbf16>
    %cst_37 = arith.constant dense<0.000000e+00> : vector<8x350xf32>
    %31 = tpu.matmul %29, %30, %cst_37 {dimension_numbers = #tpu.dot_dimension_numbers<[1], [0], [0], [1], [0, 0, 1, 1], [], []>} : vector<8x72xbf16>, vector<72x350xbf16>, vector<8x350xf32> -> vector<8x350xf32>
    %c0_38 = arith.constant 0 : index
    %c0_39 = arith.constant 0 : index
    %32 = vector.load %arg3[%c0_38, %c0_39] : memref<8x1xf32, #tpu.memory_space<vmem>>, vector<8x1xf32>
    %33 = vector.broadcast %32 : vector<8x1xf32> to vector<8x350xf32>
    %34 = arith.addf %31, %33 : vector<8x350xf32>
    %cst_40 = arith.constant 0.000000e+00 : f32
    %35 = vector.broadcast %cst_40 : f32 to vector<8x350xf32>
    %36 = arith.maximumf %34, %35 : vector<8x350xf32>
    %37 = arith.truncf %36 : vector<8x350xf32> to vector<8x350xbf16>
    %c0_41 = arith.constant 0 : index
    %c0_42 = arith.constant 0 : index
    %38 = vector.load %arg8[%c0_41, %c0_42] : memref<8x350xbf16, #tpu.memory_space<vmem>>, vector<8x350xbf16>
    tpu.vector_store %arg8[%c0_41, %c0_42], %37 {strides = array<i32>} : memref<8x350xbf16, #tpu.memory_space<vmem>>, vector<8x350xbf16>,
    %c0_43 = arith.constant 0 : index
    %c0_44 = arith.constant 0 : index
    %39 = vector.load %arg8[%c0_43, %c0_44] : memref<8x350xbf16, #tpu.memory_space<vmem>>, vector<8x316xbf16>
    %c0_45 = arith.constant 0 : index
    %c0_46 = arith.constant 0 : index
    %40 = vector.load %arg9[%c0_45, %c0_46] : memref<72x316xbf16, #tpu.memory_space<vmem>>, vector<8x316xbf16>
    tpu.vector_store %arg9[%c0_45, %c0_46], %39 {strides = array<i32>} : memref<72x316xbf16, #tpu.memory_space<vmem>>, vector<8x316xbf16>,
    %c0_47 = arith.constant 0 : index
    %c1_48 = arith.constant 1 : index
    %41 = vector.load %arg8[%c0_47, %c1_48] : memref<8x350xbf16, #tpu.memory_space<vmem>>, vector<8x316xbf16>
    %c8_49 = arith.constant 8 : index
    %c0_50 = arith.constant 0 : index
    %42 = vector.load %arg9[%c8_49, %c0_50] : memref<72x316xbf16, #tpu.memory_space<vmem>>, vector<8x316xbf16>
    tpu.vector_store %arg9[%c8_49, %c0_50], %41 {strides = array<i32>} : memref<72x316xbf16, #tpu.memory_space<vmem>>, vector<8x316xbf16>,
    %c0_51 = arith.constant 0 : index
    %c2_52 = arith.constant 2 : index
    %43 = vector.load %arg8[%c0_51, %c2_52] : memref<8x350xbf16, #tpu.memory_space<vmem>>, vector<8x316xbf16>
    %c16_53 = arith.constant 16 : index
    %c0_54 = arith.constant 0 : index
    %44 = vector.load %arg9[%c16_53, %c0_54] : memref<72x316xbf16, #tpu.memory_space<vmem>>, vector<8x316xbf16>
    tpu.vector_store %arg9[%c16_53, %c0_54], %43 {strides = array<i32>} : memref<72x316xbf16, #tpu.memory_space<vmem>>, vector<8x316xbf16>,
    %c0_55 = arith.constant 0 : index
    %c16_56 = arith.constant 16 : index
    %45 = vector.load %arg8[%c0_55, %c16_56] : memref<8x350xbf16, #tpu.memory_space<vmem>>, vector<8x316xbf16>
    %c24_57 = arith.constant 24 : index
    %c0_58 = arith.constant 0 : index
    %46 = vector.load %arg9[%c24_57, %c0_58] : memref<72x316xbf16, #tpu.memory_space<vmem>>, vector<8x316xbf16>
    tpu.vector_store %arg9[%c24_57, %c0_58], %45 {strides = array<i32>} : memref<72x316xbf16, #tpu.memory_space<vmem>>, vector<8x316xbf16>,
    %c0_59 = arith.constant 0 : index
    %c17_60 = arith.constant 17 : index
    %47 = vector.load %arg8[%c0_59, %c17_60] : memref<8x350xbf16, #tpu.memory_space<vmem>>, vector<8x316xbf16>
    %c32_61 = arith.constant 32 : index
    %c0_62 = arith.constant 0 : index
    %48 = vector.load %arg9[%c32_61, %c0_62] : memref<72x316xbf16, #tpu.memory_space<vmem>>, vector<8x316xbf16>
    tpu.vector_store %arg9[%c32_61, %c0_62], %47 {strides = array<i32>} : memref<72x316xbf16, #tpu.memory_space<vmem>>, vector<8x316xbf16>,
    %c0_63 = arith.constant 0 : index
    %c18_64 = arith.constant 18 : index
    %49 = vector.load %arg8[%c0_63, %c18_64] : memref<8x350xbf16, #tpu.memory_space<vmem>>, vector<8x316xbf16>
    %c40_65 = arith.constant 40 : index
    %c0_66 = arith.constant 0 : index
    %50 = vector.load %arg9[%c40_65, %c0_66] : memref<72x316xbf16, #tpu.memory_space<vmem>>, vector<8x316xbf16>
    tpu.vector_store %arg9[%c40_65, %c0_66], %49 {strides = array<i32>} : memref<72x316xbf16, #tpu.memory_space<vmem>>, vector<8x316xbf16>,
    %c0_67 = arith.constant 0 : index
    %c32_68 = arith.constant 32 : index
    %51 = vector.load %arg8[%c0_67, %c32_68] : memref<8x350xbf16, #tpu.memory_space<vmem>>, vector<8x316xbf16>
    %c48_69 = arith.constant 48 : index
    %c0_70 = arith.constant 0 : index
    %52 = vector.load %arg9[%c48_69, %c0_70] : memref<72x316xbf16, #tpu.memory_space<vmem>>, vector<8x316xbf16>
    tpu.vector_store %arg9[%c48_69, %c0_70], %51 {strides = array<i32>} : memref<72x316xbf16, #tpu.memory_space<vmem>>, vector<8x316xbf16>,
    %c0_71 = arith.constant 0 : index
    %c33_72 = arith.constant 33 : index
    %53 = vector.load %arg8[%c0_71, %c33_72] : memref<8x350xbf16, #tpu.memory_space<vmem>>, vector<8x316xbf16>
    %c56_73 = arith.constant 56 : index
    %c0_74 = arith.constant 0 : index
    %54 = vector.load %arg9[%c56_73, %c0_74] : memref<72x316xbf16, #tpu.memory_space<vmem>>, vector<8x316xbf16>
    tpu.vector_store %arg9[%c56_73, %c0_74], %53 {strides = array<i32>} : memref<72x316xbf16, #tpu.memory_space<vmem>>, vector<8x316xbf16>,
    %c0_75 = arith.constant 0 : index
    %c34_76 = arith.constant 34 : index
    %55 = vector.load %arg8[%c0_75, %c34_76] : memref<8x350xbf16, #tpu.memory_space<vmem>>, vector<8x316xbf16>
    %c64_77 = arith.constant 64 : index
    %c0_78 = arith.constant 0 : index
    %56 = vector.load %arg9[%c64_77, %c0_78] : memref<72x316xbf16, #tpu.memory_space<vmem>>, vector<8x316xbf16>
    tpu.vector_store %arg9[%c64_77, %c0_78], %55 {strides = array<i32>} : memref<72x316xbf16, #tpu.memory_space<vmem>>, vector<8x316xbf16>,
    %c0_79 = arith.constant 0 : index
    %c0_80 = arith.constant 0 : index
    %57 = vector.load %arg4[%c0_79, %c0_80] : memref<16x72xbf16, #tpu.memory_space<vmem>>, vector<16x72xbf16>
    %c0_81 = arith.constant 0 : index
    %c0_82 = arith.constant 0 : index
    %58 = vector.load %arg9[%c0_81, %c0_82] : memref<72x316xbf16, #tpu.memory_space<vmem>>, vector<72x316xbf16>
    %cst_83 = arith.constant dense<0.000000e+00> : vector<16x316xf32>
    %59 = tpu.matmul %57, %58, %cst_83 {dimension_numbers = #tpu.dot_dimension_numbers<[1], [0], [0], [1], [0, 0, 1, 1], [], []>} : vector<16x72xbf16>, vector<72x316xbf16>, vector<16x316xf32> -> vector<16x316xf32>
    %c0_84 = arith.constant 0 : index
    %c0_85 = arith.constant 0 : index
    %60 = vector.load %arg5[%c0_84, %c0_85] : memref<16x1xf32, #tpu.memory_space<vmem>>, vector<16x1xf32>
    %61 = vector.broadcast %60 : vector<16x1xf32> to vector<16x316xf32>
    %62 = arith.addf %59, %61 : vector<16x316xf32>
    %cst_86 = arith.constant 0.000000e+00 : f32
    %63 = vector.broadcast %cst_86 : f32 to vector<16x316xf32>
    %64 = arith.maximumf %62, %63 : vector<16x316xf32>
    %c0_87 = arith.constant 0 : index
    %c0_88 = arith.constant 0 : index
    %65 = vector.load %arg10[%c0_87, %c0_88] : memref<16x316xf32, #tpu.memory_space<vmem>>, vector<16x316xf32>
    tpu.vector_store %arg10[%c0_87, %c0_88], %64 {strides = array<i32>} : memref<16x316xf32, #tpu.memory_space<vmem>>, vector<16x316xf32>,
    %c0_89 = arith.constant 0 : index
    %c0_90 = arith.constant 0 : index
    %66 = vector.load %arg10[%c0_89, %c0_90] : memref<16x316xf32, #tpu.memory_space<vmem>>, vector<16x4xf32>
    %c0_91 = arith.constant 0 : index
    %c0_92 = arith.constant 0 : index
    %67 = vector.load %arg11[%c0_91, %c0_92] : memref<16x16xf32, #tpu.memory_space<vmem>>, vector<16x4xf32>
    tpu.vector_store %arg11[%c0_91, %c0_92], %66 {strides = array<i32>} : memref<16x16xf32, #tpu.memory_space<vmem>>, vector<16x4xf32>,
    %c0_93 = arith.constant 0 : index
    %c16_94 = arith.constant 16 : index
    %68 = vector.load %arg10[%c0_93, %c16_94] : memref<16x316xf32, #tpu.memory_space<vmem>>, vector<16x4xf32>
    %c0_95 = arith.constant 0 : index
    %c4 = arith.constant 4 : index
    %69 = vector.load %arg11[%c0_95, %c4] : memref<16x16xf32, #tpu.memory_space<vmem>>, vector<16x4xf32>
    tpu.vector_store %arg11[%c0_95, %c4], %68 {strides = array<i32>} : memref<16x16xf32, #tpu.memory_space<vmem>>, vector<16x4xf32>,
    %c0_96 = arith.constant 0 : index
    %c32_97 = arith.constant 32 : index
    %70 = vector.load %arg10[%c0_96, %c32_97] : memref<16x316xf32, #tpu.memory_space<vmem>>, vector<16x4xf32>
    %c0_98 = arith.constant 0 : index
    %c8_99 = arith.constant 8 : index
    %71 = vector.load %arg11[%c0_98, %c8_99] : memref<16x16xf32, #tpu.memory_space<vmem>>, vector<16x4xf32>
    tpu.vector_store %arg11[%c0_98, %c8_99], %70 {strides = array<i32>} : memref<16x16xf32, #tpu.memory_space<vmem>>, vector<16x4xf32>,
    %c0_100 = arith.constant 0 : index
    %c48_101 = arith.constant 48 : index
    %72 = vector.load %arg10[%c0_100, %c48_101] : memref<16x316xf32, #tpu.memory_space<vmem>>, vector<16x4xf32>
    %c0_102 = arith.constant 0 : index
    %c12 = arith.constant 12 : index
    %73 = vector.load %arg11[%c0_102, %c12] : memref<16x16xf32, #tpu.memory_space<vmem>>, vector<16x4xf32>
    tpu.vector_store %arg11[%c0_102, %c12], %72 {strides = array<i32>} : memref<16x16xf32, #tpu.memory_space<vmem>>, vector<16x4xf32>,
    %c0_103 = arith.constant 0 : index
    %c0_104 = arith.constant 0 : index
    %74 = vector.load %arg11[%c0_103, %c0_104] : memref<16x16xf32, #tpu.memory_space<vmem>>, vector<16x16xf32>
    %75 = tpu.transpose %74, [1, 0] : vector<16x16xf32> -> vector<16x16xf32>
    %c0_105 = arith.constant 0 : index
    %c128 = arith.constant 128 : index
    %76 = vector.load %arg10[%c0_105, %c128] : memref<16x316xf32, #tpu.memory_space<vmem>>, vector<16x188xf32>
    %cst_106 = arith.constant dense<0.000000e+00> : vector<16x188xf32>
    %77 = tpu.matmul %75, %76, %cst_106 {dimension_numbers = #tpu.dot_dimension_numbers<[1], [0], [0], [1], [0, 0, 1, 1], [], []>} : vector<16x16xf32>, vector<16x188xf32>, vector<16x188xf32> -> vector<16x188xf32>
    %c0_107 = arith.constant 0 : index
    %c0_108 = arith.constant 0 : index
    %78 = vector.load %arg12[%c0_107, %c0_108] : memref<16x188xf32, #tpu.memory_space<vmem>>, vector<16x188xf32>
    tpu.vector_store %arg12[%c0_107, %c0_108], %77 {strides = array<i32>} : memref<16x188xf32, #tpu.memory_space<vmem>>, vector<16x188xf32>,
    %c0_109 = arith.constant 0 : index
    %c0_110 = arith.constant 0 : index
    %79 = vector.load %arg12[%c0_109, %c0_110] : memref<16x188xf32, #tpu.memory_space<vmem>>, vector<1x137xf32>
    %c1_111 = arith.constant 1 : index
    %c1_112 = arith.constant 1 : index
    %80 = vector.load %arg12[%c1_111, %c1_112] : memref<16x188xf32, #tpu.memory_space<vmem>>, vector<1x137xf32>
    %81 = arith.addf %79, %80 : vector<1x137xf32>
    %c2_113 = arith.constant 2 : index
    %c2_114 = arith.constant 2 : index
    %82 = vector.load %arg12[%c2_113, %c2_114] : memref<16x188xf32, #tpu.memory_space<vmem>>, vector<1x137xf32>
    %83 = arith.addf %81, %82 : vector<1x137xf32>
    %c3 = arith.constant 3 : index
    %c3_115 = arith.constant 3 : index
    %84 = vector.load %arg12[%c3, %c3_115] : memref<16x188xf32, #tpu.memory_space<vmem>>, vector<1x137xf32>
    %85 = arith.addf %83, %84 : vector<1x137xf32>
    %c4_116 = arith.constant 4 : index
    %c16_117 = arith.constant 16 : index
    %86 = vector.load %arg12[%c4_116, %c16_117] : memref<16x188xf32, #tpu.memory_space<vmem>>, vector<1x137xf32>
    %87 = arith.addf %85, %86 : vector<1x137xf32>
    %c5 = arith.constant 5 : index
    %c17_118 = arith.constant 17 : index
    %88 = vector.load %arg12[%c5, %c17_118] : memref<16x188xf32, #tpu.memory_space<vmem>>, vector<1x137xf32>
    %89 = arith.addf %87, %88 : vector<1x137xf32>
    %c6 = arith.constant 6 : index
    %c18_119 = arith.constant 18 : index
    %90 = vector.load %arg12[%c6, %c18_119] : memref<16x188xf32, #tpu.memory_space<vmem>>, vector<1x137xf32>
    %91 = arith.addf %89, %90 : vector<1x137xf32>
    %c7 = arith.constant 7 : index
    %c19 = arith.constant 19 : index
    %92 = vector.load %arg12[%c7, %c19] : memref<16x188xf32, #tpu.memory_space<vmem>>, vector<1x137xf32>
    %93 = arith.addf %91, %92 : vector<1x137xf32>
    %c8_120 = arith.constant 8 : index
    %c32_121 = arith.constant 32 : index
    %94 = vector.load %arg12[%c8_120, %c32_121] : memref<16x188xf32, #tpu.memory_space<vmem>>, vector<1x137xf32>
    %95 = arith.addf %93, %94 : vector<1x137xf32>
    %c9 = arith.constant 9 : index
    %c33_122 = arith.constant 33 : index
    %96 = vector.load %arg12[%c9, %c33_122] : memref<16x188xf32, #tpu.memory_space<vmem>>, vector<1x137xf32>
    %97 = arith.addf %95, %96 : vector<1x137xf32>
    %c10 = arith.constant 10 : index
    %c34_123 = arith.constant 34 : index
    %98 = vector.load %arg12[%c10, %c34_123] : memref<16x188xf32, #tpu.memory_space<vmem>>, vector<1x137xf32>
    %99 = arith.addf %97, %98 : vector<1x137xf32>
    %c11 = arith.constant 11 : index
    %c35 = arith.constant 35 : index
    %100 = vector.load %arg12[%c11, %c35] : memref<16x188xf32, #tpu.memory_space<vmem>>, vector<1x137xf32>
    %101 = arith.addf %99, %100 : vector<1x137xf32>
    %c12_124 = arith.constant 12 : index
    %c48_125 = arith.constant 48 : index
    %102 = vector.load %arg12[%c12_124, %c48_125] : memref<16x188xf32, #tpu.memory_space<vmem>>, vector<1x137xf32>
    %103 = arith.addf %101, %102 : vector<1x137xf32>
    %c13 = arith.constant 13 : index
    %c49 = arith.constant 49 : index
    %104 = vector.load %arg12[%c13, %c49] : memref<16x188xf32, #tpu.memory_space<vmem>>, vector<1x137xf32>
    %105 = arith.addf %103, %104 : vector<1x137xf32>
    %c14 = arith.constant 14 : index
    %c50 = arith.constant 50 : index
    %106 = vector.load %arg12[%c14, %c50] : memref<16x188xf32, #tpu.memory_space<vmem>>, vector<1x137xf32>
    %107 = arith.addf %105, %106 : vector<1x137xf32>
    %c15 = arith.constant 15 : index
    %c51 = arith.constant 51 : index
    %108 = vector.load %arg12[%c15, %c51] : memref<16x188xf32, #tpu.memory_space<vmem>>, vector<1x137xf32>
    %109 = arith.addf %107, %108 : vector<1x137xf32>
    %cst_126 = arith.constant 1.000000e-03 : f32
    %110 = vector.broadcast %cst_126 : f32 to vector<1x137xf32>
    %111 = arith.mulf %110, %109 : vector<1x137xf32>
    %c0_127 = arith.constant 0 : index
    %c0_128 = arith.constant 0 : index
    %c0_129 = arith.constant 0 : index
    %112 = vector.load %arg6[%c0_127, %c0_128, %c0_129] : memref<1x1x256xf32, #tpu.memory_space<vmem>>, vector<1x1x137xf32>
    %113 = vector.shape_cast %112 : vector<1x1x137xf32> to vector<1x137xf32>
    %114 = vector.shape_cast %111 : vector<1x137xf32> to vector<1x1x137xf32>
    tpu.vector_store %arg6[%c0_127, %c0_128, %c0_129], %114 {strides = array<i32>} : memref<1x1x256xf32, #tpu.memory_space<vmem>>, vector<1x1x137xf32>,
    return
  }
  func.func @transform_0(%arg0: i32) -> (i32, i32, i32) {
    %c0_i32 = arith.constant 0 : i32
    %c0_i32_0 = arith.constant 0 : i32
    %c0_i32_1 = arith.constant 0 : i32
    return %arg0, %c0_i32, %c0_i32_0 : i32, i32, i32
  }
  func.func @transform_1(%arg0: i32) -> (i32, i32) {
    %c0_i32 = arith.constant 0 : i32
    %c0_i32_0 = arith.constant 0 : i32
    %c0_i32_1 = arith.constant 0 : i32
    return %c0_i32, %c0_i32_0 : i32, i32
  }
  func.func @transform_2(%arg0: i32) -> (i32, i32) {
    %c0_i32 = arith.constant 0 : i32
    %c0_i32_0 = arith.constant 0 : i32
    %c0_i32_1 = arith.constant 0 : i32
    return %c0_i32, %c0_i32_0 : i32, i32
  }
  func.func @transform_3(%arg0: i32) -> (i32, i32) {
    %c0_i32 = arith.constant 0 : i32
    %c0_i32_0 = arith.constant 0 : i32
    %c0_i32_1 = arith.constant 0 : i32
    return %c0_i32, %c0_i32_0 : i32, i32
  }
  func.func @transform_4(%arg0: i32) -> (i32, i32) {
    %c0_i32 = arith.constant 0 : i32
    %c0_i32_0 = arith.constant 0 : i32
    %c0_i32_1 = arith.constant 0 : i32
    return %c0_i32, %c0_i32_0 : i32, i32
  }
  func.func @transform_5(%arg0: i32) -> (i32, i32, i32) {
    %c0_i32 = arith.constant 0 : i32
    %c0_i32_0 = arith.constant 0 : i32
    %c0_i32_1 = arith.constant 0 : i32
    return %arg0, %c0_i32, %c0_i32_0 : i32, i32, i32
  }
}

</mosaic_0001>

<bundles_post_ra>
// kernel: net_forward.1
= control target key start
LH: loop header
LB: loop body
LE: loop exit
PB: predicated region body
PF: predicated region fallthrough
CT: control target
= control target key end

     0   :  { %s1510_s18 = smov 0   ;;  %s1724_s0 = inlined_call_operand.vmem [shape: bf16[2,8,384], index: 0, kind: input, shape index: {}]   ;;  %s1725_s1 = inlined_call_operand.vmem [shape: bf16[8,72], index: 1, kind: input, shape index: {}]   ;;  %s1726_s2 = inlined_call_operand.vmem [shape: f32[8,1], index: 2, kind: input, shape index: {}]   ;;  %s1727_s3 = inlined_call_operand.vmem [shape: bf16[16,72], index: 3, kind: input, shape index: {}]   ;;  %s1728_s4 = inlined_call_operand.vmem [shape: f32[16,1], index: 4, kind: input, shape index: {}]   ;;  %s1729_s5 = inlined_call_operand.vmem [shape: f32[2,1,256], index: 5, kind: output, shape index: {}]  }
   0x1 LB: > { %s1310_s19 = sadd.s32 4294967295, %s1457_s18   ;;  %p1314_p0 = scmp.ge.s32.totalorder %s1457_s18, 1  ;;  %s1457_s18 = sphi %s1510_s18, %s15_s18  }
   0x2   : > { %p187_p1 = scmp.lt.s32.totalorder %s1457_s18, 3 }
   0x4   : > { %p188_p2 = pnand %p1314_p0, %p187_p1 }
   0x5   : > { %p214_p3 = scmp.lt.s32.totalorder (!%p188_p2), %s1310_s19, 1  ;;  %v1459_v1 = vmov (!%p188_p2), 0.0   ;;  %s1460_s24 = smov (!%p188_p2), 126   ;;  %vm232_vm0 = vcmask (!%p188_p2), 764928   ;;  %v1467_v11 = vmov (!%p188_p2), 0   ;;  %vm1468_vm1 = vmmov (!%p188_p2), 0  }
   0x6   : > { %191 = sbr.rel (%p188_p2) target bundleno = 1426 (0x592), region = 40  ;;  %1374 = vmatprep.subr.bf16.mxu1 (!%p188_p2), %v1459_v1  ;;  %s1461_s25 = smov (!%p188_p2), 127   ;;  %514 = vmatprep.mubr.bf16.mxu0 (!%p188_p2), %v1467_v11  ;;  %v390_v12 = vld [vmem:[%s1726_s2] sm:$0xff] (!%p188_p2)  ;;  %vm244_vm2 = vcmask (!%p188_p2), 1043456   ;;  %vm263_vm3 = vcmask (!%p188_p2), 1031168   ;;  %vm246_vm4 = vcmask (!%p188_p2), 1039360  }
   0x7   : > { %s1462_s26 = smov (!%p188_p2), 112   ;;  %s1463_s27 = smov (!%p188_p2), 111   ;;  %1438 = vset.pattern.permute.xlu0 (!%p188_p2), %v1467_v11  ;;  %1384 = vmatprep.mubr.msk.bf16.mxu1 (!%p188_p2), %vm1468_vm1, %v1459_v1  ;;  %vm280_vm5 = vcmask (!%p188_p2), 916480   ;;  %vm297_vm6 = vcmask (!%p188_p2), 908288   ;;  %vm314_vm7 = vcmask (!%p188_p2), 900096   ;;  %vm331_vm8 = vcmask (!%p188_p2), 785408  }
   0x8   : > { %s1464_s28 = smov (!%p188_p2), 110   ;;  %s1465_s29 = smov (!%p188_p2), 96   ;;  %1439 = vset.pattern.permute.xlu1 (!%p188_p2), %v1467_v11  ;;  %vm348_vm9 = vcmask (!%p188_p2), 777216   ;;  %vm365_vm10 = vcmask (!%p188_p2), 769024   ;;  %vm468_vm11 = vcmask (!%p188_p2), 588800   ;;  %vm584_vm12 = vcmask (!%p188_p2), 486400  }
   0x9   : > { %s1466_s30 = smov (!%p188_p2), 95   ;;  %s1469_s6 = smov (!%p188_p2), 94   ;;  %vm934_vm13 = vcmask (!%p188_p2), 31744   ;;  %vm927_vm14 = vcmask (!%p188_p2), 490496   ;;  %vm947_vm15 = vcmask (!%p188_p2), 64544  }
   0xa   : > { %s1470_s17 = smov (!%p188_p2), 104   ;;  %s1472_s21 = smov (!%p188_p2), 92  }
   0xb   : > { %s1473_s22 = smov (!%p188_p2), 125  }
   0xd   : > { %s1731_s19 = smov (!%p214_p3, %s1310_s19), 1 }
   0xe   : > { %s1408_s20 = smul.u32 12, %s1731_s19 }
  0x10   : > { %s1524_s23 = scalar_lea.vmem %s1724_s0, %s1408_s20  ;;  %s1471_s20 = smov 116  }
  0x11   : > { %v1527_v0 = vld [vmem:[%s1524_s23] sm:$0xff]  ;;  %v253_v2 = vld [vmem:[%s1524_s23 + $0x8] sm:$0xf] }
  0x12   : > { %256 = vrot.lane.b32.xlu1 %v1527_v0, %s1460_s24  ;;  %238 = vrot.lane.b32.xlu0 %v1527_v0, %s1461_s25  ;;  %v235_v3 = vld [vmem:[%s1524_s23 + $0x8] sm:$0xf] }
  0x13   : > { %v230_v4 = vld [vmem:[%s1524_s23 + $0x8] sm:$0xf] }
  0x14   : > { %233 = vst.msk [vmem:[#allocation2 + $0x8] sm:$0xf] %vm232_vm0, %v230_v4  ;;  %v270_v5 = vld [vmem:[%s1524_s23 + $0x8] sm:$0xf] }
  0x15   : > { %v287_v6 = vld [vmem:[%s1524_s23 + $0x8] sm:$0xf] }
  0x16   : > { %258 = vrot.lane.b32.xlu1 %v253_v2, %s1460_s24  ;;  %240 = vrot.lane.b32.xlu0 %v235_v3, %s1461_s25  ;;  %v304_v7 = vld [vmem:[%s1524_s23 + $0x8] sm:$0xf] }
  0x17   : > { %v321_v8 = vld [vmem:[%s1524_s23 + $0x8] sm:$0xf] }
  0x18   : > { %v338_v9 = vld [vmem:[%s1524_s23 + $0x8] sm:$0xf] }
  0x19   : > { %v355_v10 = vld [vmem:[%s1524_s23 + $0x8] sm:$0xf]  ;;  %s1474_s23 = smov 109  }
  0x1a   : > { %275 = vrot.lane.b32.xlu1 %v270_v5, %s1462_s26  ;;  %273 = vrot.lane.b32.xlu0 %v1527_v0, %s1462_s26 }
  0x1e   : > { %292 = vrot.lane.b32.xlu1 %v287_v6, %s1463_s27  ;;  %290 = vrot.lane.b32.xlu0 %v1527_v0, %s1463_s27 }
  0x22   : > { %309 = vrot.lane.b32.xlu1 %v304_v7, %s1464_s28  ;;  %307 = vrot.lane.b32.xlu0 %v1527_v0, %s1464_s28 }
  0x26   : > { %326 = vrot.lane.b32.xlu1 %v321_v8, %s1465_s29  ;;  %324 = vrot.lane.b32.xlu0 %v1527_v0, %s1465_s29 }
  0x2a   : > { %343 = vrot.lane.b32.xlu1 %v338_v9, %s1466_s30  ;;  %341 = vrot.lane.b32.xlu0 %v1527_v0, %s1466_s30 }
  0x2e   : > { %360 = vrot.lane.b32.xlu1 %v355_v10, %s1469_s6  ;;  %358 = vrot.lane.b32.xlu0 %v1527_v0, %s1469_s6 }
  0x32   : > { %393 = vperm.xlu0 %1438, %v390_v12  }
  0x84   : > { %v257_v13 = vpop.permute.xlu1 %256  ;;  %v239_v14 = vpop.permute.xlu0 %238 }
  0x85   : > { %v242_v15 = vrot.slane %v239_v14, 4  ;;  %v260_v18 = vrot.slane %v257_v13, 4 }
  0x88   : > { %v259_v16 = vpop.permute.xlu1 %258  ;;  %v241_v17 = vpop.permute.xlu0 %240 }
  0x89   : > { %v261_v19 = vrot.slane %v259_v16, 4  ;;  %268 = vst.msk [vmem:[#allocation2 + $0x20] sm:$0xf] %vm232_vm0, %v259_v16  ;;  %v243_v20 = vrot.slane %v241_v17, 4  ;;  %251 = vst.msk [vmem:[#allocation2 + $0x14] sm:$0xf] %vm232_vm0, %v241_v17 }
  0x8b   : > { %v262_v21 = vsel %vm244_vm2, %v260_v18, %v261_v19  ;;  %v245_v22 = vsel %vm244_vm2, %v242_v15, %v243_v20 }
  0x8c   : > { %v264_v23 = vsel %vm263_vm3, %v257_v13, %v262_v21  ;;  %v247_v24 = vsel %vm246_vm4, %v239_v14, %v245_v22  ;;  %v276_v25 = vpop.permute.xlu1 %275  ;;  %v274_v26 = vpop.permute.xlu0 %273  ;;  %v371_v13 = vld [vmem:[%s1725_s1] sm:$0xf] }
  0x8d   : > { %v278_v27 = vrot.slane %v276_v25, 4  ;;  %285 = vst.msk [vmem:[#allocation2 + $0x2c] sm:$0xf] %vm232_vm0, %v276_v25  ;;  %v277_v28 = vrot.slane %v274_v26, 4  ;;  %v1318_v29 = vcombine.high %v1527_v0, %v247_v24  ;;  %v1317_v30 = vcombine.low %v1527_v0, %v247_v24 }
  0x8f   : > { %v279_v31 = vsel %vm244_vm2, %v277_v28, %v278_v27  ;;  %482 = vmatprep.subr.bf16.mxu0 %v1318_v29 }
  0x90   : > { %v281_v32 = vsel %vm280_vm5, %v274_v26, %v279_v31  ;;  %v293_v33 = vpop.permute.xlu1 %292  ;;  %v291_v34 = vpop.permute.xlu0 %290  ;;  %v1440_v35 = vld [vmem:[#allocation2 + $0x8] ss:$12 sps:$4 sm:$0xff]   ;;  %483 = vmatpush1.bf16.msra.mxu0 %v1317_v30 }
  0x91   : > { %v295_v36 = vrot.slane %v293_v33, 4  ;;  %302 = vst.msk [vmem:[#allocation2 + $0x38] sm:$0xf] %vm232_vm0, %v293_v33  ;;  %v294_v37 = vrot.slane %v291_v34, 4  ;;  %v1321_v38 = vcombine.high %v264_v23, %v281_v32  ;;  %v1320_v39 = vcombine.low %v264_v23, %v281_v32  ;;  %1375 = vmatpush3.bf16.msra.mxu1 %v1440_v35 }
  0x92   : > { %1376 = vmatprep.subr.bf16.mxu1 %v1459_v1 }
  0x93   : > { %v296_v40 = vsel %vm244_vm2, %v294_v37, %v295_v36  ;;  %484 = vmatprep.subr.bf16.mxu0 %v1321_v38  ;;  %v734_v38 = vld [vmem:[%s1728_s4] sm:$0xff] }
  0x94   : > { %v298_v41 = vsel %vm297_vm6, %v291_v34, %v296_v40  ;;  %v310_v42 = vpop.permute.xlu1 %309  ;;  %v308_v43 = vpop.permute.xlu0 %307  ;;  %v1441_v44 = vld [vmem:[#allocation2 + $0x20] ss:$12 sps:$4 sm:$0xff]   ;;  %485 = vmatpush1.bf16.msra.mxu0 %v1320_v39 }
  0x95   : > { %v312_v45 = vrot.slane %v310_v42, 4  ;;  %319 = vst.msk [vmem:[#allocation2 + $0x44] sm:$0xf] %vm232_vm0, %v310_v42  ;;  %v311_v46 = vrot.slane %v308_v43, 4  ;;  %1377 = vmatpush3.bf16.msra.mxu1 %v1441_v44 }
  0x96   : > { %1378 = vmatprep.subr.bf16.mxu1 %v1459_v1 }
  0x97   : > { %v313_v47 = vsel %vm244_vm2, %v311_v46, %v312_v45 }
  0x98   : > { %v315_v48 = vsel %vm314_vm7, %v308_v43, %v313_v47  ;;  %v327_v49 = vpop.permute.xlu1 %326  ;;  %v325_v50 = vpop.permute.xlu0 %324  ;;  %v735_v43 = vld [vmem:[%s1728_s4 + $0x8] sm:$0xff] }
  0x99   : > { %v329_v51 = vrot.slane %v327_v49, 4  ;;  %336 = vst.msk [vmem:[#allocation2 + $0x50] sm:$0xf] %vm232_vm0, %v327_v49  ;;  %v328_v52 = vrot.slane %v325_v50, 4  ;;  %v1324_v53 = vcombine.high %v298_v41, %v315_v48  ;;  %v1323_v54 = vcombine.low %v298_v41, %v315_v48 }
  0x9b   : > { %v330_v55 = vsel %vm244_vm2, %v328_v52, %v329_v51  ;;  %486 = vmatprep.subr.bf16.mxu0 %v1324_v53 }
  0x9c   : > { %v332_v56 = vsel %vm331_vm8, %v325_v50, %v330_v55  ;;  %v344_v57 = vpop.permute.xlu1 %343  ;;  %v342_v58 = vpop.permute.xlu0 %341  ;;  %v1442_v59 = vld [vmem:[#allocation2 + $0x38] ss:$12 sps:$4 sm:$0xff]   ;;  %487 = vmatpush1.bf16.msra.mxu0 %v1323_v54 }
  0x9d   : > { %v346_v60 = vrot.slane %v344_v57, 4  ;;  %353 = vst.msk [vmem:[#allocation2 + $0x5c] sm:$0xf] %vm232_vm0, %v344_v57  ;;  %v345_v61 = vrot.slane %v342_v58, 4  ;;  %1379 = vmatpush3.bf16.msra.mxu1 %v1442_v59 }
  0x9e   : > { %1380 = vmatprep.subr.bf16.mxu1 %v1459_v1 }
  0x9f   : > { %v347_v62 = vsel %vm244_vm2, %v345_v61, %v346_v60 }
  0xa0   : > { %v349_v63 = vsel %vm348_vm9, %v342_v58, %v347_v62  ;;  %v361_v0 = vpop.permute.xlu1 %360  ;;  %v359_v2 = vpop.permute.xlu0 %358 }
  0xa1   : > { %v363_v3 = vrot.slane %v361_v0, 4  ;;  %370 = vst.msk [vmem:[#allocation2 + $0x68] sm:$0xf] %vm232_vm0, %v361_v0  ;;  %v362_v4 = vrot.slane %v359_v2, 4  ;;  %v1327_v5 = vcombine.high %v332_v56, %v349_v63  ;;  %v1326_v6 = vcombine.low %v332_v56, %v349_v63 }
  0xa3   : > { %v364_v7 = vsel %vm244_vm2, %v362_v4, %v363_v3  ;;  %488 = vmatprep.subr.bf16.mxu0 %v1327_v5 }
  0xa4   : > { %v366_v8 = vsel %vm365_vm10, %v359_v2, %v364_v7  ;;  %v1443_v9 = vld [vmem:[#allocation2 + $0x50] ss:$12 sps:$4 sm:$0xff]   ;;  %489 = vmatpush1.bf16.msra.mxu0 %v1326_v6 }
  0xa5   : > { %v1330_v10 = vcombine.high %v366_v8, %v366_v8  ;;  %v1329_v12 = vcombine.low %v366_v8, %v366_v8  ;;  %1381 = vmatpush3.bf16.msra.mxu1 %v1443_v9 }
  0xa6   : > { %1382 = vmatprep.subr.bf16.mxu1 %v1459_v1 }
  0xa7   : > { %1332 = vmatprep.subr.msk.bf16.mxu0 %vm244_vm2, %v1330_v10  ;;  %v474_v14 = vsel %vm244_vm2, %v1329_v12, 0 }
  0xa8   : > { %v1444_v15 = vld [vmem:[#allocation2 + $0x68] ss:$0 sps:$4 sm:$0xff]   ;;  %491 = vmatpush1.bf16.msra.mxu0 %v474_v14 }
  0xa9   : > { %v480_v16 = vsel %vm244_vm2, %v1444_v15, 0 }
  0xaa   : > { %1383 = vmatpush3.bf16.msra.mxu1 %v480_v16 }
  0xab   : > { %1333 = vmatmul.mubr.msk.bf16.vlgmr.msra.gmra.mrb[0].mxu0 %vm468_vm11, %v371_v13  ;;  %1388 = vmatprep.subr.bf16.mxu1 %v1459_v1 }
  0xac   : > { %867 = vmatprep.mubr.bf16.mxu0 %v1467_v11 }
  0xad   : > { %1385 = vmatmul.mubr.msk.bf16.vlgmr.msra.gmra.mrb[0].mxu1 %vm468_vm11, %v371_v13 }
  0xae   : > { %1398 = vmatprep.mubr.msk.bf16.mxu1 %vm1468_vm1, %v1459_v1  ;;  %vm973_vm1 = vcmask 130144  }
  0xb1   : > { %v394_v17 = vpop.permute.xlu0 %393 }
 0x17e   : > { %v516_v18 = vpop.f32.mrb[0].mxu0 }
 0x17f   : > { %v517_v19 = vadd.f32 %v516_v18, %v394_v17  ;;  %v518_v20 = vpop.f32.mrb[1].mxu0 }
 0x180   : > { %v519_v21 = vadd.f32 %v518_v20, %v394_v17  ;;  %v520_v22 = vpop.f32.mrb[2].mxu0  ;;  %v557_v23 = vpop.f32.mrb[0].mxu1 }
 0x181   : > { %v563_v24 = vmax.f32 %v517_v19, 0.0  ;;  %v521_v25 = vpop.f32.mrb[3].mxu0  ;;  %v558_v26 = vadd.f32 %v557_v23, %v394_v17  ;;  %v1386_v27 = vpop.f32.mrb[1].mxu1 }
 0x182   : > { %v564_v28 = vmax.f32 %v519_v21, 0.0  ;;  %v560_v29 = vpop.f32.mrb[2].mxu1 }
 0x183   : > { %v565_v30 = vmax.f32 %v558_v26, 0.0  ;;  %v1387_v11 = vpop.f32.mrb[3].mxu1 }
 0x184   : > { %v1614_v31 = vpack.c.bf16 %v564_v28, %v563_v24 }
 0x185   : > { %v1361_v32 = vpack.c.bf16 %v565_v30, %v565_v30 }
 0x186   : > { %606 = vrot.lane.b32.xlu0 %v1614_v31, %s1460_s24 }
 0x187   : > { %580 = vst.msk [vmem:[#allocation3 + $0x8] sm:$0xf] %vm232_vm0, %v1361_v32  ;;  %vm960_vm0 = vcmask 97344  }
 0x18a   : > { %622 = vrot.lane.b32.xlu0 %v1614_v31, %s1462_s26 }
 0x18e   : > { %638 = vrot.lane.b32.xlu0 %v1614_v31, %s1463_s27  ;;  %v582_v33 = vld [vmem:[#allocation3 + $0x8] sm:$0xf] }
 0x18f   : > { %v587_v34 = vld [vmem:[#allocation3 + $0x8] sm:$0xf]  ;;  %585 = vst.msk [vmem:[#allocation4 + $0x8] sm:$0xf] %vm584_vm12, %v582_v33 }
 0x190   : > { %592 = vrot.lane.b32.xlu1 %v587_v34, %s1461_s25  ;;  %v603_v35 = vld [vmem:[#allocation3 + $0x8] sm:$0xf] }
 0x191   : > { %v619_v36 = vld [vmem:[#allocation3 + $0x8] sm:$0xf] }
 0x192   : > { %654 = vrot.lane.b32.xlu0 %v1614_v31, %s1464_s28  ;;  %v635_v37 = vld [vmem:[#allocation3 + $0x8] sm:$0xf] }
 0x193   : > { %v651_v39 = vld [vmem:[#allocation3 + $0x8] sm:$0xf] }
 0x194   : > { %608 = vrot.lane.b32.xlu1 %v603_v35, %s1460_s24  ;;  %v667_v40 = vld [vmem:[#allocation3 + $0x8] sm:$0xf] }
 0x195   : > { %v683_v41 = vld [vmem:[#allocation3 + $0x8] sm:$0xf] }
 0x196   : > { %670 = vrot.lane.b32.xlu0 %v1614_v31, %s1465_s29  ;;  %v699_v42 = vld [vmem:[#allocation3 + $0x8] sm:$0xf] }
 0x198   : > { %624 = vrot.lane.b32.xlu1 %v619_v36, %s1462_s26 }
 0x19a   : > { %686 = vrot.lane.b32.xlu0 %v1614_v31, %s1466_s30 }
 0x19c   : > { %640 = vrot.lane.b32.xlu1 %v635_v37, %s1463_s27 }
 0x19e   : > { %702 = vrot.lane.b32.xlu0 %v1614_v31, %s1469_s6 }
 0x1a0   : > { %590 = vrot.lane.b32.xlu1 %v1614_v31, %s1461_s25 }
 0x1a2   : > { %738 = vperm.xlu0 %1438, %v734_v38  }
 0x1a4   : > { %656 = vrot.lane.b32.xlu1 %v651_v39, %s1464_s28 }
 0x1a8   : > { %672 = vrot.lane.b32.xlu1 %v667_v40, %s1465_s29 }
 0x1ac   : > { %688 = vrot.lane.b32.xlu1 %v683_v41, %s1466_s30 }
 0x1b0   : > { %704 = vrot.lane.b32.xlu1 %v699_v42, %s1469_s6 }
 0x1b4   : > { %743 = vperm.xlu1 %1439, %v735_v43   ;;  %v1450_v43 = vld [vmem:[%s1727_s3] sm:$0xff]  }
 0x1f8   : > { %v607_v44 = vpop.permute.xlu0 %606 }
 0x1f9   : > { %v610_v49 = vrot.slane %v607_v44, 4 }
 0x1fc   : > { %v623_v46 = vpop.permute.xlu0 %622 }
 0x1fd   : > { %v626_v56 = vrot.slane %v623_v46, 4 }
 0x200   : > { %v639_v50 = vpop.permute.xlu0 %638 }
 0x201   : > { %v642_v62 = vrot.slane %v639_v50, 4 }
 0x202   : > { %v593_v45 = vpop.permute.xlu1 %592 }
 0x203   : > { %601 = vst.msk [vmem:[#allocation4 + $0x14] sm:$0xf] %vm584_vm12, %v593_v45  ;;  %v595_v4 = vrot.slane %v593_v45, 4 }
 0x204   : > { %v655_v60 = vpop.permute.xlu0 %654 }
 0x205   : > { %v658_v10 = vrot.slane %v655_v60, 4 }
 0x206   : > { %v609_v47 = vpop.permute.xlu1 %608 }
 0x207   : > { %v611_v48 = vrot.slane %v609_v47, 4  ;;  %617 = vst.msk [vmem:[#allocation4 + $0x20] sm:$0xf] %vm584_vm12, %v609_v47 }
 0x208   : > { %v671_v6 = vpop.permute.xlu0 %670 }
 0x209   : > { %v612_v51 = vsel %vm244_vm2, %v610_v49, %v611_v48  ;;  %v674_v20 = vrot.slane %v671_v6, 4 }
 0x20a   : > { %v613_v52 = vsel %vm263_vm3, %v607_v44, %v612_v51  ;;  %v625_v53 = vpop.permute.xlu1 %624  ;;  %v1445_v54 = vld [vmem:[#allocation4 + $0x8] ss:$12 sps:$4 sm:$0xff]  }
 0x20b   : > { %v627_v55 = vrot.slane %v625_v53, 4  ;;  %633 = vst.msk [vmem:[#allocation4 + $0x2c] sm:$0xf] %vm584_vm12, %v625_v53  ;;  %1389 = vmatpush3.bf16.msra.mxu1 %v1445_v54 }
 0x20c   : > { %1390 = vmatprep.subr.bf16.mxu1 %v1459_v1  ;;  %v687_v19 = vpop.permute.xlu0 %686 }
 0x20d   : > { %v628_v57 = vsel %vm244_vm2, %v626_v56, %v627_v55  ;;  %v690_v28 = vrot.slane %v687_v19, 4 }
 0x20e   : > { %v629_v58 = vsel %vm280_vm5, %v623_v46, %v628_v57  ;;  %v641_v59 = vpop.permute.xlu1 %640 }
 0x20f   : > { %v643_v61 = vrot.slane %v641_v59, 4  ;;  %649 = vst.msk [vmem:[#allocation4 + $0x38] sm:$0xf] %vm584_vm12, %v641_v59  ;;  %v1342_v16 = vcombine.high %v613_v52, %v629_v58  ;;  %v1341_v22 = vcombine.low %v613_v52, %v629_v58 }
 0x210   : > { %v703_v30 = vpop.permute.xlu0 %702 }
 0x211   : > { %v644_v63 = vsel %vm244_vm2, %v642_v62, %v643_v61  ;;  %v706_v34 = vrot.slane %v703_v30, 4 }
 0x212   : > { %v645_v0 = vsel %vm297_vm6, %v639_v50, %v644_v63  ;;  %v591_v2 = vpop.permute.xlu1 %590  ;;  %v1446_v3 = vld [vmem:[#allocation4 + $0x20] ss:$12 sps:$4 sm:$0xff]  }
 0x213   : > { %v594_v5 = vrot.slane %v591_v2, 4  ;;  %1391 = vmatpush3.bf16.msra.mxu1 %v1446_v3 }
 0x214   : > { %1392 = vmatprep.subr.bf16.mxu1 %v1459_v1 }
 0x215   : > { %v596_v7 = vsel %vm244_vm2, %v594_v5, %v595_v4 }
 0x216   : > { %v597_v8 = vsel %vm246_vm4, %v591_v2, %v596_v7  ;;  %v657_v9 = vpop.permute.xlu1 %656 }
 0x217   : > { %v659_v12 = vrot.slane %v657_v9, 4  ;;  %665 = vst.msk [vmem:[#allocation4 + $0x44] sm:$0xf] %vm584_vm12, %v657_v9  ;;  %v1338_v13 = vcombine.low %v1614_v31, %v597_v8  ;;  %v1339_v14 = vcombine.high %v1614_v31, %v597_v8 }
 0x219   : > { %v660_v15 = vsel %vm244_vm2, %v658_v10, %v659_v12  ;;  %835 = vmatprep.subr.bf16.mxu0 %v1339_v14 }
 0x21a   : > { %v661_v17 = vsel %vm314_vm7, %v655_v60, %v660_v15  ;;  %v673_v18 = vpop.permute.xlu1 %672  ;;  %836 = vmatpush1.bf16.msra.mxu0 %v1338_v13 }
 0x21b   : > { %v675_v21 = vrot.slane %v673_v18, 4  ;;  %681 = vst.msk [vmem:[#allocation4 + $0x50] sm:$0xf] %vm584_vm12, %v673_v18  ;;  %837 = vmatprep.subr.bf16.mxu0 %v1342_v16  ;;  %v1345_v24 = vcombine.high %v645_v0, %v661_v17  ;;  %v1344_v11 = vcombine.low %v645_v0, %v661_v17 }
 0x21d   : > { %v676_v23 = vsel %vm244_vm2, %v674_v20, %v675_v21 }
 0x21e   : > { %v677_v25 = vsel %vm331_vm8, %v671_v6, %v676_v23  ;;  %v689_v26 = vpop.permute.xlu1 %688  ;;  %v1447_v27 = vld [vmem:[#allocation4 + $0x38] ss:$12 sps:$4 sm:$0xff]   ;;  %838 = vmatpush1.bf16.msra.mxu0 %v1341_v22 }
 0x21f   : > { %v691_v29 = vrot.slane %v689_v26, 4  ;;  %697 = vst.msk [vmem:[#allocation4 + $0x5c] sm:$0xf] %vm584_vm12, %v689_v26  ;;  %839 = vmatprep.subr.bf16.mxu0 %v1345_v24  ;;  %1393 = vmatpush3.bf16.msra.mxu1 %v1447_v27 }
 0x220   : > { %1394 = vmatprep.subr.bf16.mxu1 %v1459_v1 }
 0x221   : > { %v692_v31 = vsel %vm244_vm2, %v690_v28, %v691_v29  ;;  %v739_v47 = vpop.permute.xlu0 %738 }
 0x222   : > { %v693_v32 = vsel %vm348_vm9, %v687_v19, %v692_v31  ;;  %v705_v33 = vpop.permute.xlu1 %704  ;;  %840 = vmatpush1.bf16.msra.mxu0 %v1344_v11 }
 0x223   : > { %v707_v35 = vrot.slane %v705_v33, 4  ;;  %713 = vst.msk [vmem:[#allocation4 + $0x68] sm:$0xf] %vm584_vm12, %v705_v33  ;;  %v1347_v36 = vcombine.low %v677_v25, %v693_v32  ;;  %v1348_v37 = vcombine.high %v677_v25, %v693_v32  ;;  %vm1129_vm12 = vcmask 1022976  }
 0x225   : > { %v708_v38 = vsel %vm244_vm2, %v706_v34, %v707_v35  ;;  %841 = vmatprep.subr.bf16.mxu0 %v1348_v37  ;;  %v224_v35 = vlaneseq }
 0x226   : > { %v709_v39 = vsel %vm365_vm10, %v703_v30, %v708_v38  ;;  %v1448_v40 = vld [vmem:[#allocation4 + $0x50] ss:$12 sps:$4 sm:$0xff]   ;;  %842 = vmatpush1.bf16.msra.mxu0 %v1347_v36 }
 0x227   : > { %v1351_v41 = vcombine.high %v709_v39, %v709_v39  ;;  %v1350_v42 = vcombine.low %v709_v39, %v709_v39  ;;  %1395 = vmatpush3.bf16.msra.mxu1 %v1448_v40 }
 0x228   : > { %1396 = vmatprep.subr.bf16.mxu1 %v1459_v1 }
 0x229   : > { %1353 = vmatprep.subr.msk.bf16.mxu0 %vm244_vm2, %v1351_v41  ;;  %v827_v44 = vsel %vm244_vm2, %v1350_v42, 0 }
 0x22a   : > { %v1449_v45 = vld [vmem:[#allocation4 + $0x68] ss:$0 sps:$4 sm:$0xff]   ;;  %844 = vmatpush1.bf16.msra.mxu0 %v827_v44 }
 0x22b   : > { %v833_v46 = vsel %vm244_vm2, %v1449_v45, 0  ;;  %vm1014_vm2 = vcmask 130048  }
 0x22c   : > { %1397 = vmatpush3.bf16.msra.mxu1 %v833_v46 }
 0x22d   : > { %1354 = vmatmul.mubr.msk.bf16.vlgmr.msra.gmra.mrb[4].mxu0 %vm468_vm11, %v1450_v43 }
 0x22e   : > { %1085 = vmatprep.mubr.f32.mxu0 %v1459_v1 }
 0x22f   : > { %1399 = vmatmul.mubr.msk.bf16.vlgmr.msra.gmra.mrb[4].mxu1 %vm468_vm11, %v1450_v43  ;;  %vm226_vm11 = vcmp.lt.s32.totalorder %v224_v35, 256 }
 0x230   : > { %1091 = vmatprep.mubr.f32.mxu1 %v1459_v1 }
 0x233   : > { %v744_v48 = vpop.permute.xlu1 %743 }
 0x300   : > { %v869_v49 = vpop.f32.mrb[4].mxu0 }
 0x301   : > { %v870_v50 = vadd.f32 %v869_v49, %v739_v47  ;;  %v871_v51 = vpop.f32.mrb[5].mxu0 }
 0x302   : > { %v872_v52 = vadd.f32 %v871_v51, %v739_v47  ;;  %v873_v53 = vpop.f32.mrb[6].mxu0  ;;  %v912_v54 = vpop.f32.mrb[4].mxu1 }
 0x303   : > { %v919_v55 = vmax.f32 %v870_v50, 0.0  ;;  %v874_v56 = vadd.f32 %v873_v53, %v744_v48  ;;  %v875_v57 = vpop.f32.mrb[7].mxu0  ;;  %v913_v58 = vadd.f32 %v912_v54, %v739_v47  ;;  %v1400_v59 = vpop.f32.mrb[5].mxu1 }
 0x304   : > { %v920_v60 = vmax.f32 %v872_v52, 0.0  ;;  %v876_v61 = vadd.f32 %v875_v57, %v744_v48  ;;  %v915_v62 = vpop.f32.mrb[6].mxu1 }
 0x305   : > { %v922_v63 = vmax.f32 %v874_v56, 0.0  ;;  %954 = vrot.lane.b32.xlu1 %v919_v55, %s1470_s17  ;;  %941 = vrot.lane.b32.xlu0 %v919_v55, %s1471_s20  ;;  %935 = vst.msk [vmem:[#allocation6] sm:$0xff] %vm934_vm13, %v919_v55  ;;  %v921_v0 = vmax.f32 %v913_v58, 0.0  ;;  %v916_v2 = vadd.f32 %v915_v62, %v744_v48  ;;  %v1401_v4 = vpop.f32.mrb[7].mxu1 }
 0x306   : > { %v923_v3 = vmax.f32 %v876_v61, 0.0 }
 0x307   : > { %936 = vst.msk [vmem:[#allocation6 + $0x8] sm:$0xff] %vm934_vm13, %v922_v63  ;;  %v924_v5 = vmax.f32 %v916_v2, 0.0 }
 0x308   : > { %928 = vst.msk [vmem:[#allocation5 + $0x10] sm:$0xff] %vm927_vm14, %v921_v0  ;;  %v1404_v6 = vpack.c.bf16 %v923_v3, %v920_v60 }
 0x309   : > { %967 = vrot.lane.b32.xlu1 %v919_v55, %s1472_s21  ;;  %943 = vrot.lane.b32.xlu0 %v922_v63, %s1471_s20  ;;  %931 = vst.msk [vmem:[#allocation5 + $0x28] sm:$0xff] %vm927_vm14, %v924_v5 }
 0x30d   : > { %969 = vrot.lane.b32.xlu1 %v922_v63, %s1472_s21  ;;  %956 = vrot.lane.b32.xlu0 %v922_v63, %s1470_s17 }
 0x30f   : > { %v1011_v7 = vld [vmem:[#allocation5 + $0x10] sm:$0xff] }
 0x310   : > { %v1013_v8 = vld [vmem:[#allocation5 + $0x28] sm:$0xff] }
 0x311   : > { %v1402_v9 = vpack.c.bf16 %v1013_v8, %v1011_v7 }
 0x313   : > { %1403 = vmatprep.subr.bf16.mxu0 %v1402_v9  ;;  %1406 = vmatprep.subr.bf16.mxu1 %v1402_v9 }
 0x314   : > { %1405 = vmatpush1.bf16.msra.mxu0 %v1404_v6  ;;  %1407 = vmatpush1.bf16.msra.mxu1 %v1404_v6 }
 0x377   : > { %v955_v10 = vpop.permute.xlu1 %954  ;;  %v942_v12 = vpop.permute.xlu0 %941 }
 0x378   : > { %948 = vst.msk [vmem:[#allocation6] sm:$0xff] %vm947_vm15, %v942_v12 }
 0x379   : > { %961 = vst.msk [vmem:[#allocation6] sm:$0xff] %vm960_vm0, %v955_v10 }
 0x37b   : > { %v968_v13 = vpop.permute.xlu1 %967  ;;  %v944_v14 = vpop.permute.xlu0 %943 }
 0x37c   : > { %974 = vst.msk [vmem:[#allocation6] sm:$0xff] %vm973_vm1, %v968_v13 }
 0x37d   : > { %949 = vst.msk [vmem:[#allocation6 + $0x8] sm:$0xff] %vm947_vm15, %v944_v14 }
 0x37f   : > { %v970_v15 = vpop.permute.xlu1 %969  ;;  %v957_v16 = vpop.permute.xlu0 %956 }
 0x380   : > { %962 = vst.msk [vmem:[#allocation6 + $0x8] sm:$0xff] %vm960_vm0, %v957_v16 }
 0x381   : > { %975 = vst.msk [vmem:[#allocation6 + $0x8] sm:$0xff] %vm973_vm1, %v970_v15 }
 0x383   : > { %v976_v17 = vld [vmem:[#allocation6] sm:$0xff] }
 0x384   : > { %978 = vxpose.xlu0.b32.start [1/2] (short) (narrow) %v976_v17, 16 }
 0x388   : > { %v977_v18 = vld [vmem:[#allocation6 + $0x8] sm:$0xff] }
 0x389   : > { %979 = vxpose.xlu0.b32.end [2/2] (short) (narrow) %v977_v18, 16 }
 0x405   : > { %v994_v19 = vpop.trf.xlu0 }
 0x406   : > { %1356 = vmatmul.mubr.msk.f32.vlgmr.msra.gmra.mrb[8].mxu0 %vm1014_vm2, %v994_v19 }
 0x409   : > { %v995_v20 = vpop.trf.xlu0 }
 0x40a   : > { %1357 = vmatmul.mubr.msk.f32.vlgmr.msra.gmra.mrb[8].mxu1 %vm1014_vm2, %v995_v20 }
 0x4d9   : > { %v1087_v21 = vpop.f32.mrb[8].mxu0 }
 0x4da   : > { %1098 = vst [vmem:[#allocation7] sm:$0xff] %v1087_v21  ;;  %v1089_v22 = vpop.f32.mrb[9].mxu0 }
 0x4db   : > { %1099 = vst.msk [vmem:[#allocation7 + $0x8] sm:$0xff] %vm927_vm14, %v1089_v22 }
 0x4dd   : > { %v1093_v23 = vpop.f32.mrb[8].mxu1 }
 0x4de   : > { %1100 = vst [vmem:[#allocation7 + $0x10] sm:$0xff] %v1093_v23  ;;  %v1095_v24 = vpop.f32.mrb[9].mxu1 }
 0x4df   : > { %1101 = vst.msk [vmem:[#allocation7 + $0x18] sm:$0xff] %vm927_vm14, %v1095_v24 }
 0x4e2   : > { %v1104_v25 = vld [vmem:[#allocation7 + $0x1] ss:$8 sm:$0x3]  ;;  %v1114_v26 = vld [vmem:[#allocation7 + $0x2] ss:$8 sm:$0x3] }
 0x4e3   : > { %1106 = vrot.lane.b32.xlu1 %v1104_v25, %s1461_s25  ;;  %v1124_v28 = vld [vmem:[#allocation7 + $0x3] ss:$8 sm:$0x3]  ;;  %v1134_v29 = vld [vmem:[#allocation7 + $0x4] ss:$8 sm:$0x3] }
 0x4e4   : > { %v1144_v30 = vld [vmem:[#allocation7 + $0x5] ss:$8 sm:$0x3]  ;;  %v1154_v11 = vld [vmem:[#allocation7 + $0x6] ss:$8 sm:$0x3] }
 0x4e5   : > { %v1164_v31 = vld [vmem:[#allocation7 + $0x7] ss:$8 sm:$0x3]  ;;  %s1316_s25 = sshll.u32 %s1731_s19, 1  ;;  %s1479_s19 = smov 77  }
 0x4e6   : > { %v1194_v27 = vld [vmem:[#allocation7 + $0x12] ss:$8 sm:$0x3]  ;;  %v1174_v32 = vld [vmem:[#allocation7 + $0x10] ss:$8 sm:$0x3] }
 0x4e7   : > { %1116 = vrot.lane.b32.xlu1 %v1114_v26, %s1460_s24  ;;  %1196 = vrot.lane.b32.xlu0 %v1194_v27, %s1469_s6  ;;  %v1184_v33 = vld [vmem:[#allocation7 + $0x11] ss:$8 sm:$0x3]  ;;  %v1204_v34 = vld [vmem:[#allocation7 + $0x13] ss:$8 sm:$0x3]  ;;  %s1706_s6 = scalar_lea.vmem %s1729_s5, %s1316_s25 }
 0x4e8   : > { %s1475_s24 = smov 93   ;;  %v1214_v36 = vld [vmem:[#allocation7 + $0x14] ss:$8 sm:$0x3]  ;;  %228 = vst.msk [vmem:[%s1706_s6] sm:$0x3] %vm226_vm11, %v1459_v1 }
 0x4e9   : > { %v1224_v37 = vld [vmem:[#allocation7 + $0x15] ss:$8 sm:$0x3]  ;;  %v1234_v38 = vld [vmem:[#allocation7 + $0x16] ss:$8 sm:$0x3] }
 0x4ea   : > { %v1244_v39 = vld [vmem:[#allocation7 + $0x17] ss:$8 sm:$0x3]  ;;  %v1102_v49 = vld [vmem:[#allocation7] ss:$8 sm:$0x3] }
 0x4eb   : > { %1126 = vrot.lane.b32.xlu1 %v1124_v28, %s1473_s22 }
 0x4ef   : > { %1136 = vrot.lane.b32.xlu1 %v1134_v29, %s1462_s26 }
 0x4f3   : > { %1146 = vrot.lane.b32.xlu1 %v1144_v30, %s1463_s27 }
 0x4f7   : > { %1156 = vrot.lane.b32.xlu1 %v1154_v11, %s1464_s28  ;;  %s1476_s28 = smov 80  }
 0x4fb   : > { %1166 = vrot.lane.b32.xlu1 %v1164_v31, %s1474_s23 }
 0x4ff   : > { %1176 = vrot.lane.b32.xlu1 %v1174_v32, %s1465_s29  ;;  %s1477_s29 = smov 79  }
 0x503   : > { %1186 = vrot.lane.b32.xlu1 %v1184_v33, %s1466_s30  ;;  %s1478_s30 = smov 78  }
 0x507   : > { %1206 = vrot.lane.b32.xlu1 %v1204_v34, %s1475_s24 }
 0x50b   : > { %1216 = vrot.lane.b32.xlu1 %v1214_v36, %s1476_s28 }
 0x50f   : > { %1226 = vrot.lane.b32.xlu1 %v1224_v37, %s1477_s29 }
 0x513   : > { %1236 = vrot.lane.b32.xlu1 %v1234_v38, %s1478_s30 }
 0x517   : > { %1246 = vrot.lane.b32.xlu1 %v1244_v39, %s1479_s19 }
 0x555   : > { %v1107_v40 = vpop.permute.xlu1 %1106 }
 0x556   : > { %v1108_v45 = vrot.slane %v1107_v40, 1 }
 0x558   : > { %v1110_v48 = vsel %vm246_vm4, %v1107_v40, %v1108_v45  ;;  %vm1169_vm4 = vcmask 891904  }
 0x559   : > { %v1117_v41 = vpop.permute.xlu1 %1116  ;;  %v1112_v52 = vadd.f32 %v1110_v48, %v1102_v49  ;;  %v1197_v10 = vpop.permute.xlu0 %1196 }
 0x55a   : > { %v1118_v46 = vrot.slane %v1117_v41, 1  ;;  %v1198_v15 = vrot.slane %v1197_v10, 1 }
 0x55c   : > { %v1120_v50 = vsel %vm263_vm3, %v1117_v41, %v1118_v46  ;;  %vm1209_vm3 = vcmask 760832   ;;  %v1200_v19 = vsel %vm365_vm10, %v1197_v10, %v1198_v15 }
 0x55d   : > { %v1127_v42 = vpop.permute.xlu1 %1126  ;;  %v1122_v56 = vadd.f32 %v1120_v50, %v1112_v52 }
 0x55e   : > { %v1128_v1 = vrot.slane %v1127_v42, 1 }
 0x560   : > { %v1130_v54 = vsel %vm1129_vm12, %v1127_v42, %v1128_v1 }
 0x561   : > { %v1137_v43 = vpop.permute.xlu1 %1136  ;;  %v1132_v59 = vadd.f32 %v1130_v54, %v1122_v56 }
 0x562   : > { %v1138_v51 = vrot.slane %v1137_v43, 1 }
 0x564   : > { %v1140_v57 = vsel %vm280_vm5, %v1137_v43, %v1138_v51  ;;  %vm1219_vm5 = vcmask 654336  }
 0x565   : > { %v1147_v44 = vpop.permute.xlu1 %1146  ;;  %v1142_v63 = vadd.f32 %v1140_v57, %v1132_v59 }
 0x566   : > { %v1148_v55 = vrot.slane %v1147_v44, 1 }
 0x568   : > { %v1150_v61 = vsel %vm297_vm6, %v1147_v44, %v1148_v55  ;;  %vm1229_vm6 = vcmask 646144  }
 0x569   : > { %v1157_v47 = vpop.permute.xlu1 %1156  ;;  %v1152_v3 = vadd.f32 %v1150_v61, %v1142_v63 }
 0x56a   : > { %v1158_v58 = vrot.slane %v1157_v47, 1 }
 0x56c   : > { %v1160_v0 = vsel %vm314_vm7, %v1157_v47, %v1158_v58  ;;  %vm1239_vm7 = vcmask 637952  }
 0x56d   : > { %v1167_v53 = vpop.permute.xlu1 %1166  ;;  %v1162_v7 = vadd.f32 %v1160_v0, %v1152_v3 }
 0x56e   : > { %v1168_v62 = vrot.slane %v1167_v53, 1 }
 0x570   : > { %v1170_v5 = vsel %vm1169_vm4, %v1167_v53, %v1168_v62 }
 0x571   : > { %v1177_v60 = vpop.permute.xlu1 %1176  ;;  %v1172_v9 = vadd.f32 %v1170_v5, %v1162_v7 }
 0x572   : > { %v1178_v2 = vrot.slane %v1177_v60, 1 }
 0x574   : > { %v1180_v8 = vsel %vm331_vm8, %v1177_v60, %v1178_v2  ;;  %vm1249_vm8 = vcmask 629760  }
 0x575   : > { %v1187_v4 = vpop.permute.xlu1 %1186  ;;  %v1182_v14 = vadd.f32 %v1180_v8, %v1172_v9 }
 0x576   : > { %v1188_v6 = vrot.slane %v1187_v4, 1 }
 0x578   : > { %v1190_v13 = vsel %vm348_vm9, %v1187_v4, %v1188_v6  ;;  %vm1254_vm9 = vcmp.lt.s32.totalorder %v224_v35, 137 }
 0x579   : > { %v1207_v12 = vpop.permute.xlu1 %1206  ;;  %v1192_v16 = vadd.f32 %v1190_v13, %v1182_v14 }
 0x57a   : > { %v1208_v18 = vrot.slane %v1207_v12, 1 }
 0x57b   : > { %v1202_v21 = vadd.f32 %v1200_v19, %v1192_v16 }
 0x57c   : > { %v1210_v23 = vsel %vm1209_vm3, %v1207_v12, %v1208_v18 }
 0x57d   : > { %v1217_v17 = vpop.permute.xlu1 %1216  ;;  %v1212_v26 = vadd.f32 %v1210_v23, %v1202_v21 }
 0x57e   : > { %v1218_v20 = vrot.slane %v1217_v17, 1 }
 0x580   : > { %v1220_v25 = vsel %vm1219_vm5, %v1217_v17, %v1218_v20 }
 0x581   : > { %v1227_v22 = vpop.permute.xlu1 %1226  ;;  %v1222_v30 = vadd.f32 %v1220_v25, %v1212_v26 }
 0x582   : > { %v1228_v24 = vrot.slane %v1227_v22, 1 }
 0x584   : > { %v1230_v28 = vsel %vm1229_vm6, %v1227_v22, %v1228_v24 }
 0x585   : > { %v1237_v27 = vpop.permute.xlu1 %1236  ;;  %v1232_v31 = vadd.f32 %v1230_v28, %v1222_v30 }
 0x586   : > { %v1238_v29 = vrot.slane %v1237_v27, 1 }
 0x588   : > { %v1240_v11 = vsel %vm1239_vm7, %v1237_v27, %v1238_v29 }
 0x589   : > { %v1247_v32 = vpop.permute.xlu1 %1246  ;;  %v1242_v34 = vadd.f32 %v1240_v11, %v1232_v31 }
 0x58a   : > { %v1248_v33 = vrot.slane %v1247_v32, 1 }
 0x58c   : > { %v1250_v36 = vsel %vm1249_vm8, %v1247_v32, %v1248_v33 }
 0x58d   : > { %v1252_v37 = vadd.f32 %v1250_v36, %v1242_v34 }
 0x58f   : > { %v1253_v38 = vmul.f32 0.001, %v1252_v37 }
 0x591   : > { %1256 = vst.msk [vmem:[%s1706_s6] sm:$0x3] %vm1254_vm9, %v1253_v38 }
 0x592 PF: > { %s15_s18 = sadd.s32 1, %s1457_s18  }
 0x593   : > { %p12_p4 = scmp.ge.s32.totalorder %s15_s18, 4  }
 0x595   :  { %14 = sbr.rel (!%p12_p4) target bundleno = 1 (0x1), region = 85 }

</bundles_post_ra>
